<compile_context>
chip_gen: v7x
topology: tpu7x:2x2x1
jax: 0.10.0
libtpu: 0.0.40
codegen_flags: <defaults>
</compile_context>

<pallas_src>
import jax
import jax.numpy as jnp
from jax.experimental import pallas as pl
from jax.experimental.pallas import tpu as pltpu

_LANE = 128
_TILE_B_MAX = 8192                 # batch rows per grid step (multiple of 128)
_VMEM_LIMIT = 48 * 1024 * 1024     # > all scoped defaults, < v7x physical 64 MiB


def _round_up(n, m):
    return ((n + m - 1) // m) * m


def _mlp_kernel(x_ref,
                w1_ref, b1_ref,
                w2_ref, b2_ref,
                w3_ref, b3_ref,
                w4_ref, b4_ref,
                w5_ref, b5_ref,
                out_ref):
    # Everything is feature-major: x_ref (2, TB), h (feat, TB), out (outSize, TB).
    # ---- Layer 1 (in=2): two VPU broadcast FMAs, all f32 (no MXU pass for K=2) ----
    x = x_ref[...]                           # (2, TB)   f32
    w1 = w1_ref[...]                         # (25, 2)   f32
    h = w1[:, 0:1] * x[0:1, :] + w1[:, 1:2] * x[1:2, :] + b1_ref[...]
    h = jnp.maximum(h, 0.0)

    # ---- Layers 2..4: f32 MXU, (out, in) @ (in, TB), f32 bias add + ReLU ----
    h = jnp.dot(w2_ref[...], h, preferred_element_type=jnp.float32) + b2_ref[...]
    h = jnp.maximum(h, 0.0)
    h = jnp.dot(w3_ref[...], h, preferred_element_type=jnp.float32) + b3_ref[...]
    h = jnp.maximum(h, 0.0)
    h = jnp.dot(w4_ref[...], h, preferred_element_type=jnp.float32) + b4_ref[...]
    h = jnp.maximum(h, 0.0)

    # ---- Layer 5 (no activation): un-padded, lane-dense store along the batch dim ----
    h = jnp.dot(w5_ref[...], h, preferred_element_type=jnp.float32) + b5_ref[...]
    out_ref[...] = h.astype(out_ref.dtype)


def prepare_params(params):
    """One-time parameter prep (hoisted out of the forward path).
    params: list of (W, b) with W in PyTorch (out, in) layout, b of shape (out,).
    Returns f32 W (out, in) and b reshaped to (out, 1) column vectors."""
    return tuple((jnp.asarray(w, jnp.float32),
                  jnp.asarray(b, jnp.float32).reshape(-1, 1))
                 for w, b in params)


@jax.jit
def pod_network_forward(x, prepped):
    """x: (B, 2) float32.  prepped: output of prepare_params.  Returns (B, outSize)."""
    B = x.shape[0]
    (w1, b1), (w2, b2), (w3, b3), (w4, b4), (w5, b5) = prepped
    out_size = w5.shape[0]

    # Remainder-aware batch tiling: tile_b is a multiple of 128 (lane dim) chosen so
    # b_pad wastes at most one small remainder per tile instead of a whole max tile.
    num_tiles = -(-B // _TILE_B_MAX)
    tile_b = _round_up(-(-B // num_tiles), _LANE)
    b_pad = num_tiles * tile_b

    # Feature-major input (2, B): lane-dense rows, cheap DMA, no (tile_b, 2) lane-sparse
    # block eating VMEM.  Padded batch columns produce garbage that is sliced off below.
    xt = x.T
    if b_pad != B:
        xt = jnp.pad(xt, ((0, 0), (0, b_pad - B)))

    flat_args = [xt, w1, b1, w2, b2, w3, b3, w4, b4, w5, b5]

    # Weights/biases: whole array with a constant block index -> DMA'd once, resident
    # in VMEM across all grid steps (so no per-step re-fetch bookkeeping to speak of).
    resident_specs = [pl.BlockSpec(a.shape, lambda i: (0, 0)) for a in flat_args[1:]]
    in_specs = [pl.BlockSpec((2, tile_b), lambda i: (0, i))] + resident_specs

    yt_pad = pl.pallas_call(
        _mlp_kernel,
        out_shape=jax.ShapeDtypeStruct((out_size, b_pad), jnp.float32),
        grid=(num_tiles,),
        in_specs=in_specs,
        out_specs=pl.BlockSpec((out_size, tile_b), lambda i: (0, i)),
        compiler_params=pltpu.CompilerParams(
            # "parallel" is the portable megacore hint; on v7x switch to
            # pltpu.CORE_PARALLEL if the batch axis does not shard across both TCs.
            dimension_semantics=("parallel",),
            vmem_limit_bytes=_VMEM_LIMIT),
    )(*flat_args)

    # (outSize, B) -> (B, outSize); the small external transpose is far cheaper than
    # writing a 128-lane zero-padded (B, 128) block from the kernel.
    return yt_pad[:, :B].T


def _init_linear(key, in_dim, out_dim):
    """PyTorch nn.Linear default init: U(+-1/sqrt(in)); W kept in (out, in) layout."""
    kw, kb = jax.random.split(key)
    bound = 1.0 / (in_dim ** 0.5)
    w = jax.random.uniform(kw, (out_dim, in_dim), jnp.float32, -bound, bound)
    b = jax.random.uniform(kb, (out_dim,), jnp.float32, -bound, bound)
    return w, b


def make_params(key, out_size):
    dims = [(2, 25), (25, 50), (50, 100), (100, 50), (50, out_size)]
    keys = jax.random.split(key, len(dims))
    return [_init_linear(k, i, o) for k, (i, o) in zip(keys, dims)]


def _reference_forward(x, params):
    h = x
    n = len(params)
    with jax.default_matmul_precision("highest"):
        for idx, (w, b) in enumerate(params):
            h = h @ w.T + b
            if idx < n - 1:
                h = jnp.maximum(h, 0.0)
    return h


if __name__ == "__main__":
    key = jax.random.PRNGKey(0)
    k_x, k_p = jax.random.split(key)

    out_size = 16
    batch = 8
    x = jax.random.normal(k_x, (batch, 2), jnp.float32)
    params = make_params(k_p, out_size)
    prepped = prepare_params(params)          # hoisted, one-time parameter prep

    y = pod_network_forward(x, prepped)
    y = jax.block_until_ready(y)

    y_ref = _reference_forward(x, params)
    assert y.shape == (batch, out_size)
    # All-f32 kernel: much tighter than the previous 3e-2 (which covered bf16 MXU
    # operands); remaining slack covers MXU pass rounding on older generations.
    assert jnp.allclose(y, y_ref, atol=5e-3, rtol=5e-3), "mismatch vs reference"

    print("KERNEL_OK")
</pallas_src>

<mosaic_0001>
module attributes {stable_mosaic.version = 11 : i64} {
  func.func @_mlp_kernel(%arg0: i32, %arg1: memref<2x128xf32, #tpu.memory_space<vmem>>, %arg2: memref<25x2xf32, #tpu.memory_space<vmem>>, %arg3: memref<25x1xf32, #tpu.memory_space<vmem>>, %arg4: memref<50x25xf32, #tpu.memory_space<vmem>>, %arg5: memref<50x1xf32, #tpu.memory_space<vmem>>, %arg6: memref<100x50xf32, #tpu.memory_space<vmem>>, %arg7: memref<100x1xf32, #tpu.memory_space<vmem>>, %arg8: memref<50x100xf32, #tpu.memory_space<vmem>>, %arg9: memref<50x1xf32, #tpu.memory_space<vmem>>, %arg10: memref<16x50xf32, #tpu.memory_space<vmem>>, %arg11: memref<16x1xf32, #tpu.memory_space<vmem>>, %arg12: memref<16x128xf32, #tpu.memory_space<vmem>>) attributes {dimension_semantics = [#tpu.dimension_semantics<parallel>], iteration_bounds = array<i64: 1>, scalar_prefetch = 0 : i64, scratch_operands = 0 : i64, tpu.core_type = #tpu.core_type<tc>, window_params = [{transform_indices = @transform_0, window_bounds = array<i64: 2, 128>}, {pipeline_mode = #tpu.pipeline_mode<synchronous>, transform_indices = @transform_1, window_bounds = array<i64: 25, 2>}, {pipeline_mode = #tpu.pipeline_mode<synchronous>, transform_indices = @transform_2, window_bounds = array<i64: 25, 1>}, {pipeline_mode = #tpu.pipeline_mode<synchronous>, transform_indices = @transform_3, window_bounds = array<i64: 50, 25>}, {pipeline_mode = #tpu.pipeline_mode<synchronous>, transform_indices = @transform_4, window_bounds = array<i64: 50, 1>}, {pipeline_mode = #tpu.pipeline_mode<synchronous>, transform_indices = @transform_5, window_bounds = array<i64: 100, 50>}, {pipeline_mode = #tpu.pipeline_mode<synchronous>, transform_indices = @transform_6, window_bounds = array<i64: 100, 1>}, {pipeline_mode = #tpu.pipeline_mode<synchronous>, transform_indices = @transform_7, window_bounds = array<i64: 50, 100>}, {pipeline_mode = #tpu.pipeline_mode<synchronous>, transform_indices = @transform_8, window_bounds = array<i64: 50, 1>}, {pipeline_mode = #tpu.pipeline_mode<synchronous>, transform_indices = @transform_9, window_bounds = array<i64: 16, 50>}, {pipeline_mode = #tpu.pipeline_mode<synchronous>, transform_indices = @transform_10, window_bounds = array<i64: 16, 1>}, {transform_indices = @transform_11, window_bounds = array<i64: 16, 128>}]} {
    %c0 = arith.constant 0 : index
    %c0_0 = arith.constant 0 : index
    %0 = vector.load %arg1[%c0, %c0_0] : memref<2x128xf32, #tpu.memory_space<vmem>>, vector<2x128xf32>
    %c0_1 = arith.constant 0 : index
    %c0_2 = arith.constant 0 : index
    %1 = vector.load %arg2[%c0_1, %c0_2] : memref<25x2xf32, #tpu.memory_space<vmem>>, vector<25x2xf32>
    %2 = vector.extract_strided_slice %1 {offsets = [0, 0], sizes = [25, 1], strides = [1, 1]} : vector<25x2xf32> to vector<25x1xf32>
    %3 = vector.extract_strided_slice %0 {offsets = [0, 0], sizes = [1, 128], strides = [1, 1]} : vector<2x128xf32> to vector<1x128xf32>
    %4 = vector.broadcast %2 : vector<25x1xf32> to vector<25x128xf32>
    %5 = vector.broadcast %3 : vector<1x128xf32> to vector<25x128xf32>
    %6 = arith.mulf %4, %5 : vector<25x128xf32>
    %7 = vector.extract_strided_slice %1 {offsets = [0, 1], sizes = [25, 1], strides = [1, 1]} : vector<25x2xf32> to vector<25x1xf32>
    %8 = vector.extract_strided_slice %0 {offsets = [1, 0], sizes = [1, 128], strides = [1, 1]} : vector<2x128xf32> to vector<1x128xf32>
    %9 = vector.broadcast %7 : vector<25x1xf32> to vector<25x128xf32>
    %10 = vector.broadcast %8 : vector<1x128xf32> to vector<25x128xf32>
    %11 = arith.mulf %9, %10 : vector<25x128xf32>
    %12 = arith.addf %6, %11 : vector<25x128xf32>
    %c0_3 = arith.constant 0 : index
    %c0_4 = arith.constant 0 : index
    %13 = vector.load %arg3[%c0_3, %c0_4] : memref<25x1xf32, #tpu.memory_space<vmem>>, vector<25x1xf32>
    %14 = vector.broadcast %13 : vector<25x1xf32> to vector<25x128xf32>
    %15 = arith.addf %12, %14 : vector<25x128xf32>
    %cst = arith.constant 0.000000e+00 : f32
    %16 = vector.broadcast %cst : f32 to vector<25x128xf32>
    %17 = arith.maximumf %15, %16 : vector<25x128xf32>
    %c0_5 = arith.constant 0 : index
    %c0_6 = arith.constant 0 : index
    %18 = vector.load %arg4[%c0_5, %c0_6] : memref<50x25xf32, #tpu.memory_space<vmem>>, vector<50x25xf32>
    %cst_7 = arith.constant dense<0.000000e+00> : vector<50x128xf32>
    %19 = tpu.matmul %18, %17, %cst_7 {dimension_numbers = #tpu.dot_dimension_numbers<[1], [0], [0], [1], [0, 0, 1, 1], [], []>} : vector<50x25xf32>, vector<25x128xf32>, vector<50x128xf32> -> vector<50x128xf32>
    %c0_8 = arith.constant 0 : index
    %c0_9 = arith.constant 0 : index
    %20 = vector.load %arg5[%c0_8, %c0_9] : memref<50x1xf32, #tpu.memory_space<vmem>>, vector<50x1xf32>
    %21 = vector.broadcast %20 : vector<50x1xf32> to vector<50x128xf32>
    %22 = arith.addf %19, %21 : vector<50x128xf32>
    %cst_10 = arith.constant 0.000000e+00 : f32
    %23 = vector.broadcast %cst_10 : f32 to vector<50x128xf32>
    %24 = arith.maximumf %22, %23 : vector<50x128xf32>
    %c0_11 = arith.constant 0 : index
    %c0_12 = arith.constant 0 : index
    %25 = vector.load %arg6[%c0_11, %c0_12] : memref<100x50xf32, #tpu.memory_space<vmem>>, vector<100x50xf32>
    %cst_13 = arith.constant dense<0.000000e+00> : vector<100x128xf32>
    %26 = tpu.matmul %25, %24, %cst_13 {dimension_numbers = #tpu.dot_dimension_numbers<[1], [0], [0], [1], [0, 0, 1, 1], [], []>} : vector<100x50xf32>, vector<50x128xf32>, vector<100x128xf32> -> vector<100x128xf32>
    %c0_14 = arith.constant 0 : index
    %c0_15 = arith.constant 0 : index
    %27 = vector.load %arg7[%c0_14, %c0_15] : memref<100x1xf32, #tpu.memory_space<vmem>>, vector<100x1xf32>
    %28 = vector.broadcast %27 : vector<100x1xf32> to vector<100x128xf32>
    %29 = arith.addf %26, %28 : vector<100x128xf32>
    %cst_16 = arith.constant 0.000000e+00 : f32
    %30 = vector.broadcast %cst_16 : f32 to vector<100x128xf32>
    %31 = arith.maximumf %29, %30 : vector<100x128xf32>
    %c0_17 = arith.constant 0 : index
    %c0_18 = arith.constant 0 : index
    %32 = vector.load %arg8[%c0_17, %c0_18] : memref<50x100xf32, #tpu.memory_space<vmem>>, vector<50x100xf32>
    %cst_19 = arith.constant dense<0.000000e+00> : vector<50x128xf32>
    %33 = tpu.matmul %32, %31, %cst_19 {dimension_numbers = #tpu.dot_dimension_numbers<[1], [0], [0], [1], [0, 0, 1, 1], [], []>} : vector<50x100xf32>, vector<100x128xf32>, vector<50x128xf32> -> vector<50x128xf32>
    %c0_20 = arith.constant 0 : index
    %c0_21 = arith.constant 0 : index
    %34 = vector.load %arg9[%c0_20, %c0_21] : memref<50x1xf32, #tpu.memory_space<vmem>>, vector<50x1xf32>
    %35 = vector.broadcast %34 : vector<50x1xf32> to vector<50x128xf32>
    %36 = arith.addf %33, %35 : vector<50x128xf32>
    %cst_22 = arith.constant 0.000000e+00 : f32
    %37 = vector.broadcast %cst_22 : f32 to vector<50x128xf32>
    %38 = arith.maximumf %36, %37 : vector<50x128xf32>
    %c0_23 = arith.constant 0 : index
    %c0_24 = arith.constant 0 : index
    %39 = vector.load %arg10[%c0_23, %c0_24] : memref<16x50xf32, #tpu.memory_space<vmem>>, vector<16x50xf32>
    %cst_25 = arith.constant dense<0.000000e+00> : vector<16x128xf32>
    %40 = tpu.matmul %39, %38, %cst_25 {dimension_numbers = #tpu.dot_dimension_numbers<[1], [0], [0], [1], [0, 0, 1, 1], [], []>} : vector<16x50xf32>, vector<50x128xf32>, vector<16x128xf32> -> vector<16x128xf32>
    %c0_26 = arith.constant 0 : index
    %c0_27 = arith.constant 0 : index
    %41 = vector.load %arg11[%c0_26, %c0_27] : memref<16x1xf32, #tpu.memory_space<vmem>>, vector<16x1xf32>
    %42 = vector.broadcast %41 : vector<16x1xf32> to vector<16x128xf32>
    %43 = arith.addf %40, %42 : vector<16x128xf32>
    %c0_28 = arith.constant 0 : index
    %c0_29 = arith.constant 0 : index
    %44 = vector.load %arg12[%c0_28, %c0_29] : memref<16x128xf32, #tpu.memory_space<vmem>>, vector<16x128xf32>
    tpu.vector_store %arg12[%c0_28, %c0_29], %43 {strides = array<i32>} : memref<16x128xf32, #tpu.memory_space<vmem>>, vector<16x128xf32>,
    return
  }
  func.func @transform_0(%arg0: i32) -> (i32, i32) {
    %c0_i32 = arith.constant 0 : i32
    %c0_i32_0 = arith.constant 0 : i32
    return %c0_i32, %arg0 : i32, i32
  }
  func.func @transform_1(%arg0: i32) -> (i32, i32) {
    %c0_i32 = arith.constant 0 : i32
    %c0_i32_0 = arith.constant 0 : i32
    %c0_i32_1 = arith.constant 0 : i32
    return %c0_i32, %c0_i32_0 : i32, i32
  }
  func.func @transform_2(%arg0: i32) -> (i32, i32) {
    %c0_i32 = arith.constant 0 : i32
    %c0_i32_0 = arith.constant 0 : i32
    %c0_i32_1 = arith.constant 0 : i32
    return %c0_i32, %c0_i32_0 : i32, i32
  }
  func.func @transform_3(%arg0: i32) -> (i32, i32) {
    %c0_i32 = arith.constant 0 : i32
    %c0_i32_0 = arith.constant 0 : i32
    %c0_i32_1 = arith.constant 0 : i32
    return %c0_i32, %c0_i32_0 : i32, i32
  }
  func.func @transform_4(%arg0: i32) -> (i32, i32) {
    %c0_i32 = arith.constant 0 : i32
    %c0_i32_0 = arith.constant 0 : i32
    %c0_i32_1 = arith.constant 0 : i32
    return %c0_i32, %c0_i32_0 : i32, i32
  }
  func.func @transform_5(%arg0: i32) -> (i32, i32) {
    %c0_i32 = arith.constant 0 : i32
    %c0_i32_0 = arith.constant 0 : i32
    %c0_i32_1 = arith.constant 0 : i32
    return %c0_i32, %c0_i32_0 : i32, i32
  }
  func.func @transform_6(%arg0: i32) -> (i32, i32) {
    %c0_i32 = arith.constant 0 : i32
    %c0_i32_0 = arith.constant 0 : i32
    %c0_i32_1 = arith.constant 0 : i32
    return %c0_i32, %c0_i32_0 : i32, i32
  }
  func.func @transform_7(%arg0: i32) -> (i32, i32) {
    %c0_i32 = arith.constant 0 : i32
    %c0_i32_0 = arith.constant 0 : i32
    %c0_i32_1 = arith.constant 0 : i32
    return %c0_i32, %c0_i32_0 : i32, i32
  }
  func.func @transform_8(%arg0: i32) -> (i32, i32) {
    %c0_i32 = arith.constant 0 : i32
    %c0_i32_0 = arith.constant 0 : i32
    %c0_i32_1 = arith.constant 0 : i32
    return %c0_i32, %c0_i32_0 : i32, i32
  }
  func.func @transform_9(%arg0: i32) -> (i32, i32) {
    %c0_i32 = arith.constant 0 : i32
    %c0_i32_0 = arith.constant 0 : i32
    %c0_i32_1 = arith.constant 0 : i32
    return %c0_i32, %c0_i32_0 : i32, i32
  }
  func.func @transform_10(%arg0: i32) -> (i32, i32) {
    %c0_i32 = arith.constant 0 : i32
    %c0_i32_0 = arith.constant 0 : i32
    %c0_i32_1 = arith.constant 0 : i32
    return %c0_i32, %c0_i32_0 : i32, i32
  }
  func.func @transform_11(%arg0: i32) -> (i32, i32) {
    %c0_i32 = arith.constant 0 : i32
    %c0_i32_0 = arith.constant 0 : i32
    return %c0_i32, %arg0 : i32, i32
  }
}

</mosaic_0001>

<bundles_post_ra>
// kernel: pod_network_forward.1
= control target key start
LH: loop header
LB: loop body
LE: loop exit
PB: predicated region body
PF: predicated region fallthrough
CT: control target
= control target key end

     0   :  { %v1174_v0 = vmov 1   ;;  %v1175_v4 = vmov 0   ;;  %v1176_v12 = vmov 0.0|0.0   ;;  %vm1177_vm0 = vmmov 0   ;;  %s1546_s1 = inlined_call_operand.vmem [shape: f32[25,2], index: 1, kind: input, shape index: {}]   ;;  %s1547_s2 = inlined_call_operand.vmem [shape: f32[25,1], index: 2, kind: input, shape index: {}]   ;;  %s1548_s4 = inlined_call_operand.vmem [shape: f32[50,1], index: 4, kind: input, shape index: {}]   ;;  %s1549_s6 = inlined_call_operand.vmem [shape: f32[100,1], index: 6, kind: input, shape index: {}]   ;;  %s1550_s8 = inlined_call_operand.vmem [shape: f32[50,1], index: 8, kind: input, shape index: {}]   ;;  %s1551_s10 = inlined_call_operand.vmem [shape: f32[16,1], index: 10, kind: input, shape index: {}]   ;;  %s1552_s0 = inlined_call_operand.vmem [shape: f32[2,128], index: 0, kind: input, shape index: {}]   ;;  %s1553_s3 = inlined_call_operand.vmem [shape: f32[50,25], index: 3, kind: input, shape index: {}]   ;;  %s1554_s5 = inlined_call_operand.vmem [shape: f32[100,50], index: 5, kind: input, shape index: {}]   ;;  %s1555_s7 = inlined_call_operand.vmem [shape: f32[50,100], index: 7, kind: input, shape index: {}]   ;;  %s1556_s9 = inlined_call_operand.vmem [shape: f32[16,50], index: 9, kind: input, shape index: {}]   ;;  %s1557_s11 = inlined_call_operand.vmem [shape: f32[16,128], index: 11, kind: output, shape index: {}]  }
   0x1   :  { %1170 = vset.pattern.permute.xlu0 %v1174_v0  ;;  %1168 = vset.pattern.permute.xlu1 %v1174_v0  ;;  %v41_v1 = vld [vmem:[%s1546_s1 + $0x10] sm:$0xff]  ;;  %v39_v2 = vld [vmem:[%s1546_s1] sm:$0xff]  ;;  %v40_v3 = vld [vmem:[%s1546_s1 + $0x8] sm:$0xff]  ;;  %v1178_v18 = vmov 0.0   ;;  %v63_v41 = vlaneseq  ;;  %vm202_vm1 = vcmask 1040384   ;;  %vm1179_vm2 = vmmov 1  }
   0x2   :  { %80 = vperm.xlu0 %1170, %v41_v1   ;;  %72 = vperm.xlu1 %1168, %v39_v2   ;;  %v42_v5 = vld [vmem:[%s1546_s1 + $0x18] sm:$0x1]  ;;  %v100_v6 = vld [vmem:[%s1547_s2 + $0x8] sm:$0xff]  ;;  %v99_v7 = vld [vmem:[%s1547_s2] sm:$0xff]  ;;  %vm180_vm4 = vcmask 203776   ;;  %vm444_vm5 = vcmask 1041408  }
   0x3   :  { %v138_v8 = vld [vmem:[%s1548_s4] sm:$0xff]  ;;  %v101_v9 = vld [vmem:[%s1547_s2 + $0x10] sm:$0xff]  ;;  %v102_v11 = vld [vmem:[%s1547_s2 + $0x18] sm:$0x1]  ;;  %1116 = vmatprep.subr.bf16.mxu0 %v1176_v12  ;;  %1123 = vmatprep.subr.bf16.mxu1 %v1176_v12  ;;  %v64_v44 = vshrl.u32 %v63_v41, 7  ;;  %vm404_vm6 = vcmask 408576  }
   0x4   :  { %v140_v10 = vld [vmem:[%s1548_s4 + $0x10] sm:$0xff]  ;;  %v142_v13 = vld [vmem:[%s1548_s4 + $0x20] sm:$0xff]  ;;  %v139_v14 = vld [vmem:[%s1548_s4 + $0x8] sm:$0xff]  ;;  %978 = vmatprep.mubr.msk.f32.mxu0 %vm1177_vm0, %v1178_v18  ;;  %1013 = vmatprep.mubr.msk.f32.mxu1 %vm1177_vm0, %v1178_v18  ;;  %vm662_vm7 = vcmask 1043456   ;;  %vm640_vm8 = vcmask 818176  }
   0x5   :  { %v144_v15 = vld [vmem:[%s1548_s4 + $0x30] sm:$0x3]  ;;  %v141_v16 = vld [vmem:[%s1548_s4 + $0x18] sm:$0xff]  ;;  %v327_v17 = vld [vmem:[%s1549_s6 + $0x8] sm:$0xff]  ;;  %v65_v47 = vsub.s32 0, %v64_v44  ;;  %v89_v48 = vsub.s32 1, %v64_v44 }
   0x6   :  { %1171 = vset.pattern.permute.xlu0 %v1175_v4  ;;  %76 = vperm.xlu1 %1168, %v40_v3   ;;  %v143_v19 = vld [vmem:[%s1548_s4 + $0x28] sm:$0xff]  ;;  %v329_v20 = vld [vmem:[%s1549_s6 + $0x18] sm:$0xff]  ;;  %v326_v21 = vld [vmem:[%s1549_s6] sm:$0xff] }
   0x7   :  { %45 = vperm.xlu0 %1171, %v39_v2   ;;  %v331_v22 = vld [vmem:[%s1549_s6 + $0x28] sm:$0xff]  ;;  %v328_v23 = vld [vmem:[%s1549_s6 + $0x10] sm:$0xff]  ;;  %v333_v24 = vld [vmem:[%s1549_s6 + $0x38] sm:$0xff] }
   0x8   :  { %v330_v25 = vld [vmem:[%s1549_s6 + $0x20] sm:$0xff]  ;;  %v335_v26 = vld [vmem:[%s1549_s6 + $0x48] sm:$0xff]  ;;  %v332_v27 = vld [vmem:[%s1549_s6 + $0x30] sm:$0xff] }
   0x9   :  { %v337_v28 = vld [vmem:[%s1549_s6 + $0x58] sm:$0xff]  ;;  %v334_v29 = vld [vmem:[%s1549_s6 + $0x40] sm:$0xff]  ;;  %v336_v31 = vld [vmem:[%s1549_s6 + $0x50] sm:$0xff] }
   0xa   :  { %1169 = vset.pattern.permute.xlu1 %v1175_v4  ;;  %v598_v30 = vld [vmem:[%s1550_s8] sm:$0xff]  ;;  %v600_v32 = vld [vmem:[%s1550_s8 + $0x10] sm:$0xff]  ;;  %v599_v35 = vld [vmem:[%s1550_s8 + $0x8] sm:$0xff] }
   0xb   :  { %50 = vperm.xlu0 %1171, %v40_v3   ;;  %60 = vperm.xlu1 %1169, %v42_v5   ;;  %v338_v33 = vld [vmem:[%s1549_s6 + $0x60] sm:$0xf]  ;;  %v604_v36 = vld [vmem:[%s1550_s8 + $0x30] sm:$0x3]  ;;  %v601_v37 = vld [vmem:[%s1550_s8 + $0x18] sm:$0xff] }
   0xc   :  { %v602_v34 = vld [vmem:[%s1550_s8 + $0x20] sm:$0xff]  ;;  %v776_v38 = vld [vmem:[%s1551_s10 + $0x8] sm:$0xff]  ;;  %vm1121_vm3 = vmpackc.low %vm202_vm1, %vm1179_vm2 }
   0xd   :  { %v603_v39 = vld [vmem:[%s1550_s8 + $0x28] sm:$0xff]  ;;  %v775_v40 = vld [vmem:[%s1551_s10] sm:$0xff] }
   0xe   :  { %v38_v49 = vld [vmem:[%s1552_s0] sm:$0x3] }
   0xf   :  { %55 = vperm.xlu0 %1171, %v41_v1   ;;  %1172 = vset.pattern.permute.xlu1 %v1174_v0  ;;  %v66_v52 = vrot.slane %v38_v49, %v65_v47  ;;  %v90_v53 = vrot.slane %v38_v49, %v89_v48 }
  0x10   :  { %84 = vperm.xlu1 %1172, %v42_v5  }
  0x13   :  { %110 = vperm.xlu0 %1171, %v100_v6  }
  0x14   :  { %1173 = vset.pattern.permute.xlu1 %v1175_v4 }
  0x15   :  { %105 = vperm.xlu1 %1173, %v99_v7  }
  0x17   :  { %147 = vperm.xlu0 %1171, %v138_v8  }
  0x19   :  { %115 = vperm.xlu1 %1173, %v101_v9  }
  0x1b   :  { %157 = vperm.xlu0 %1171, %v140_v10  }
  0x1d   :  { %120 = vperm.xlu1 %1173, %v102_v11  }
  0x1f   :  { %167 = vperm.xlu0 %1171, %v142_v13  }
  0x21   :  { %152 = vperm.xlu1 %1173, %v139_v14  }
  0x23   :  { %177 = vperm.xlu0 %1171, %v144_v15  }
  0x25   :  { %162 = vperm.xlu1 %1173, %v141_v16  }
  0x27   :  { %346 = vperm.xlu0 %1171, %v327_v17  }
  0x29   :  { %172 = vperm.xlu1 %1173, %v143_v19  }
  0x2b   :  { %356 = vperm.xlu0 %1171, %v329_v20   ;;  %v131_v20 = vld [vmem:[%s1553_s3] sm:$0xff] }
  0x2d   :  { %341 = vperm.xlu1 %1173, %v326_v21   ;;  %v132_v21 = vld [vmem:[%s1553_s3 + $0x8] sm:$0xff] }
  0x2f   :  { %366 = vperm.xlu0 %1171, %v331_v22   ;;  %v133_v22 = vld [vmem:[%s1553_s3 + $0x10] sm:$0xff] }
  0x31   :  { %351 = vperm.xlu1 %1173, %v328_v23   ;;  %v134_v23 = vld [vmem:[%s1553_s3 + $0x18] sm:$0xff] }
  0x33   :  { %376 = vperm.xlu0 %1171, %v333_v24   ;;  %v135_v24 = vld [vmem:[%s1553_s3 + $0x20] sm:$0xff] }
  0x35   :  { %361 = vperm.xlu1 %1173, %v330_v25   ;;  %v136_v25 = vld [vmem:[%s1553_s3 + $0x28] sm:$0xff] }
  0x37   :  { %386 = vperm.xlu0 %1171, %v335_v26   ;;  %v137_v26 = vld [vmem:[%s1553_s3 + $0x30] sm:$0x3] }
  0x39   :  { %371 = vperm.xlu1 %1173, %v332_v27  }
  0x3b   :  { %396 = vperm.xlu0 %1171, %v337_v28  }
  0x3d   :  { %381 = vperm.xlu1 %1173, %v334_v29  }
  0x3f   :  { %607 = vperm.xlu0 %1171, %v598_v30  }
  0x41   :  { %391 = vperm.xlu1 %1173, %v336_v31  }
  0x43   :  { %617 = vperm.xlu0 %1171, %v600_v32  }
  0x45   :  { %401 = vperm.xlu1 %1173, %v338_v33  }
  0x47   :  { %627 = vperm.xlu0 %1171, %v602_v34  }
  0x49   :  { %612 = vperm.xlu1 %1173, %v599_v35  }
  0x4b   :  { %637 = vperm.xlu0 %1171, %v604_v36  }
  0x4d   :  { %622 = vperm.xlu1 %1173, %v601_v37  }
  0x4f   :  { %784 = vperm.xlu0 %1171, %v776_v38  }
  0x51   :  { %632 = vperm.xlu1 %1173, %v603_v39  }
  0x55   :  { %779 = vperm.xlu1 %1173, %v775_v40  }
  0x81   :  { %v73_v42 = vpop.permute.xlu1 %72  ;;  %v81_v43 = vpop.permute.xlu0 %80 }
  0x82   :  { %v91_v59 = vmul.f32 %v90_v53, %v73_v42  ;;  %v93_v3 = vmul.f32 %v90_v53, %v81_v43 }
  0x85   :  { %v77_v45 = vpop.permute.xlu1 %76 }
  0x86   :  { %v46_v46 = vpop.permute.xlu0 %45  ;;  %v92_v56 = vmul.f32 %v90_v53, %v77_v45 }
  0x87   :  { %v67_v57 = vmul.f32 %v66_v52, %v46_v46 }
  0x89   :  { %v95_v63 = vadd.f32 %v91_v59, %v67_v57 }
  0x8a   :  { %v51_v50 = vpop.permute.xlu0 %50  ;;  %v61_v51 = vpop.permute.xlu1 %60 }
  0x8b   :  { %v68_v54 = vmul.f32 %v66_v52, %v51_v50  ;;  %v70_v8 = vmul.f32 %v66_v52, %v61_v51 }
  0x8d   :  { %v96_v60 = vadd.f32 %v92_v56, %v68_v54 }
  0x8e   :  { %v56_v55 = vpop.permute.xlu0 %55 }
  0x8f   :  { %v85_v58 = vpop.permute.xlu1 %84  ;;  %v69_v1 = vmul.f32 %v66_v52, %v56_v55 }
  0x90   :  { %v94_v4 = vmul.f32 %v90_v53, %v85_v58 }
  0x91   :  { %v97_v9 = vadd.f32 %v93_v3, %v69_v1  ;;  %v313_v1 = vld [vmem:[%s1554_s5] sm:$0xff]  ;;  %v315_v3 = vld [vmem:[%s1554_s5 + $0x10] sm:$0xff] }
  0x92   :  { %v111_v61 = vpop.permute.xlu0 %110  ;;  %v98_v13 = vadd.f32 %v94_v4, %v70_v8  ;;  %v316_v4 = vld [vmem:[%s1554_s5 + $0x18] sm:$0xff] }
  0x93   :  { %v124_v62 = vadd.f32 %v111_v61, %v96_v60  ;;  %v320_v8 = vld [vmem:[%s1554_s5 + $0x38] sm:$0xff] }
  0x94   :  { %v106_v0 = vpop.permute.xlu1 %105 }
  0x95   :  { %v123_v2 = vadd.f32 %v106_v0, %v95_v63  ;;  %v128_v5 = vmax.f32 %v124_v62, 0.0 }
  0x96   :  { %v148_v29 = vpop.permute.xlu0 %147 }
  0x97   :  { %v127_v6 = vmax.f32 %v123_v2, 0.0  ;;  %v314_v2 = vld [vmem:[%s1554_s5 + $0x8] sm:$0xff] }
  0x98   :  { %v116_v7 = vpop.permute.xlu1 %115 }
  0x99   :  { %v1117_v10 = vpack.c.bf16 %v128_v5, %v127_v6  ;;  %v125_v11 = vadd.f32 %v116_v7, %v97_v9  ;;  %v317_v5 = vld [vmem:[%s1554_s5 + $0x20] sm:$0xff]  ;;  %v318_v6 = vld [vmem:[%s1554_s5 + $0x28] sm:$0xff]  ;;  %v319_v7 = vld [vmem:[%s1554_s5 + $0x30] sm:$0xff] }
  0x9a   :  { %v158_v40 = vpop.permute.xlu0 %157  ;;  %v321_v9 = vld [vmem:[%s1554_s5 + $0x40] sm:$0xff] }
  0x9b   :  { %1118 = vmatpush3.bf16.msra.mxu0 %v1117_v10  ;;  %v129_v16 = vmax.f32 %v125_v11, 0.0  ;;  %v322_v10 = vld [vmem:[%s1554_s5 + $0x48] sm:$0xff]  ;;  %v323_v11 = vld [vmem:[%s1554_s5 + $0x50] sm:$0xff] }
  0x9c   :  { %v121_v14 = vpop.permute.xlu1 %120  ;;  %1119 = vmatprep.subr.bf16.mxu0 %v1176_v12 }
  0x9d   :  { %v126_v15 = vadd.f32 %v121_v14, %v98_v13  ;;  %v324_v13 = vld [vmem:[%s1554_s5 + $0x58] sm:$0xff]  ;;  %v325_v14 = vld [vmem:[%s1554_s5 + $0x60] sm:$0xf] }
  0x9e   :  { %v168_v51 = vpop.permute.xlu0 %167 }
  0x9f   :  { %v130_v17 = vmax.f32 %v126_v15, 0.0 }
  0xa0   :  { %v153_v31 = vpop.permute.xlu1 %152 }
  0xa1   :  { %v1120_v19 = vpack.c.bf16 %v130_v17, %v129_v16 }
  0xa2   :  { %v178_v59 = vpop.permute.xlu0 %177 }
  0xa3   :  { %1122 = vmatpush3.bf16.msk.msra.mxu0 %vm1121_vm3, %v1120_v19 }
  0xa4   :  { %1132 = vmatprep.subr.bf16.mxu0 %v1176_v12  ;;  %v163_v42 = vpop.permute.xlu1 %162 }
  0xa6   :  { %979 = vmatmul.mubr.msk.f32.vlgmr.msra.gmra.mrb[0].mxu0 %vm180_vm4, %v131_v20  ;;  %v347_v20 = vpop.permute.xlu0 %346 }
  0xa7   :  { %981 = vmatprep.mubr.msk.f32.mxu0 %vm1177_vm0, %v1178_v18 }
  0xa8   :  { %v173_v53 = vpop.permute.xlu1 %172 }
  0xaa   :  { %982 = vmatmul.mubr.msk.f32.gmra.mrb[2].mxu0 %vm180_vm4, %v132_v21 }
  0xab   :  { %984 = vmatprep.mubr.msk.f32.mxu0 %vm1177_vm0, %v1178_v18 }
  0xac   :  { %v342_v17 = vpop.permute.xlu1 %341 }
  0xae   :  { %985 = vmatmul.mubr.msk.f32.gmra.mrb[4].mxu0 %vm180_vm4, %v133_v22 }
  0xaf   :  { %987 = vmatprep.mubr.msk.f32.mxu0 %vm1177_vm0, %v1178_v18 }
  0xb2   :  { %988 = vmatmul.mubr.msk.f32.gmra.mrb[6].mxu0 %vm180_vm4, %v134_v23 }
  0xb3   :  { %990 = vmatprep.mubr.msk.f32.mxu0 %vm1177_vm0, %v1178_v18 }
  0xb6   :  { %991 = vmatmul.mubr.msk.f32.gmra.mrb[8].mxu0 %vm180_vm4, %v135_v24 }
  0xb7   :  { %993 = vmatprep.mubr.msk.f32.mxu0 %vm1177_vm0, %v1178_v18 }
  0xba   :  { %994 = vmatmul.mubr.msk.f32.gmra.mrb[10].mxu0 %vm180_vm4, %v136_v25 }
  0xbb   :  { %996 = vmatprep.mubr.msk.f32.mxu0 %vm1177_vm0, %v1178_v18 }
  0xbe   :  { %997 = vmatmul.mubr.msk.f32.gmra.mrb[12].mxu0 %vm180_vm4, %v137_v26 }
  0xbf   :  { %1078 = vmatprep.mubr.msk.f32.mxu0 %vm1177_vm0, %v1178_v18 }
 0x179   :  { %v272_v27 = vpop.f32.mrb[0].mxu0 }
 0x17a   :  { %v980_v28 = vpop.f32.mrb[1].mxu0  ;;  %v273_v30 = vadd.f32 %v272_v27, %v148_v29  ;;  %v352_v29 = vpop.permute.xlu1 %351 }
 0x17c   :  { %v306_v35 = vmax.f32 %v273_v30, 0.0 }
 0x17d   :  { %v277_v32 = vpop.f32.mrb[2].mxu0 }
 0x17e   :  { %v278_v33 = vadd.f32 %v277_v32, %v153_v31  ;;  %v983_v34 = vpop.f32.mrb[3].mxu0  ;;  %v357_v31 = vpop.permute.xlu0 %356 }
 0x180   :  { %v307_v36 = vmax.f32 %v278_v33, 0.0 }
 0x181   :  { %v282_v37 = vpop.f32.mrb[4].mxu0 }
 0x182   :  { %v986_v38 = vpop.f32.mrb[5].mxu0  ;;  %v1124_v39 = vpack.c.bf16 %v307_v36, %v306_v35  ;;  %v283_v41 = vadd.f32 %v282_v37, %v158_v40  ;;  %v362_v40 = vpop.permute.xlu1 %361 }
 0x184   :  { %1125 = vmatpush3.bf16.msra.mxu1 %v1124_v39  ;;  %v308_v46 = vmax.f32 %v283_v41, 0.0 }
 0x185   :  { %v287_v43 = vpop.f32.mrb[6].mxu0  ;;  %1126 = vmatprep.subr.bf16.mxu1 %v1176_v12 }
 0x186   :  { %v288_v44 = vadd.f32 %v287_v43, %v163_v42  ;;  %v989_v45 = vpop.f32.mrb[7].mxu0  ;;  %v367_v42 = vpop.permute.xlu0 %366 }
 0x188   :  { %v309_v47 = vmax.f32 %v288_v44, 0.0 }
 0x189   :  { %v292_v48 = vpop.f32.mrb[8].mxu0 }
 0x18a   :  { %v1127_v49 = vpack.c.bf16 %v309_v47, %v308_v46  ;;  %v992_v50 = vpop.f32.mrb[9].mxu0  ;;  %v293_v52 = vadd.f32 %v292_v48, %v168_v51  ;;  %v372_v51 = vpop.permute.xlu1 %371 }
 0x18c   :  { %1128 = vmatpush3.bf16.msra.mxu1 %v1127_v49  ;;  %v310_v57 = vmax.f32 %v293_v52, 0.0 }
 0x18d   :  { %v297_v54 = vpop.f32.mrb[10].mxu0  ;;  %1129 = vmatprep.subr.bf16.mxu1 %v1176_v12 }
 0x18e   :  { %v298_v55 = vadd.f32 %v297_v54, %v173_v53  ;;  %v995_v56 = vpop.f32.mrb[11].mxu0  ;;  %v377_v53 = vpop.permute.xlu0 %376 }
 0x190   :  { %v311_v58 = vmax.f32 %v298_v55, 0.0 }
 0x191   :  { %v302_v60 = vpop.f32.mrb[12].mxu0 }
 0x192   :  { %v1130_v61 = vpack.c.bf16 %v311_v58, %v310_v57  ;;  %v303_v62 = vadd.f32 %v302_v60, %v178_v59  ;;  %v998_v63 = vpop.f32.mrb[13].mxu0 }
 0x194   :  { %1131 = vmatpush3.bf16.msra.mxu1 %v1130_v61  ;;  %v312_v0 = vmax.f32 %v303_v62, 0.0  ;;  %v382_v62 = vpop.permute.xlu1 %381 }
 0x195   :  { %1011 = vmatprep.subr.mxu1 %v1178_v18 }
 0x198   :  { %1012 = vmatpush3.msk.msra.mxu1 %vm444_vm5, %v312_v0  ;;  %v387_v0 = vpop.permute.xlu0 %386 }
 0x199   :  { %1014 = vmatmul.mubr.msk.f32.vlgmr.msra.gmra.mrb[0].mxu1 %vm404_vm6, %v313_v1 }
 0x19a   :  { %1016 = vmatprep.mubr.msk.f32.mxu1 %vm1177_vm0, %v1178_v18 }
 0x19d   :  { %1017 = vmatmul.mubr.msk.f32.gmra.mrb[2].mxu1 %vm404_vm6, %v314_v2 }
 0x19e   :  { %1019 = vmatprep.mubr.msk.f32.mxu1 %vm1177_vm0, %v1178_v18 }
 0x1a1   :  { %1020 = vmatmul.mubr.msk.f32.gmra.mrb[4].mxu1 %vm404_vm6, %v315_v3 }
 0x1a2   :  { %1022 = vmatprep.mubr.msk.f32.mxu1 %vm1177_vm0, %v1178_v18 }
 0x1a5   :  { %1023 = vmatmul.mubr.msk.f32.gmra.mrb[6].mxu1 %vm404_vm6, %v316_v4 }
 0x1a6   :  { %1025 = vmatprep.mubr.msk.f32.mxu1 %vm1177_vm0, %v1178_v18 }
 0x1a9   :  { %1026 = vmatmul.mubr.msk.f32.gmra.mrb[8].mxu1 %vm404_vm6, %v317_v5 }
 0x1aa   :  { %1028 = vmatprep.mubr.msk.f32.mxu1 %vm1177_vm0, %v1178_v18 }
 0x1ad   :  { %1029 = vmatmul.mubr.msk.f32.gmra.mrb[10].mxu1 %vm404_vm6, %v318_v6 }
 0x1ae   :  { %1031 = vmatprep.mubr.msk.f32.mxu1 %vm1177_vm0, %v1178_v18 }
 0x1b1   :  { %1032 = vmatmul.mubr.msk.f32.gmra.mrb[12].mxu1 %vm404_vm6, %v319_v7 }
 0x1b2   :  { %1034 = vmatprep.mubr.msk.f32.mxu1 %vm1177_vm0, %v1178_v18 }
 0x1b5   :  { %1035 = vmatmul.mubr.msk.f32.gmra.mrb[14].mxu1 %vm404_vm6, %v320_v8 }
 0x1b6   :  { %1037 = vmatprep.mubr.msk.f32.mxu1 %vm1177_vm0, %v1178_v18 }
 0x1b9   :  { %1038 = vmatmul.mubr.msk.f32.gmra.mrb[16].mxu1 %vm404_vm6, %v321_v9  ;;  %v392_v9 = vpop.permute.xlu1 %391 }
 0x1ba   :  { %1040 = vmatprep.mubr.msk.f32.mxu1 %vm1177_vm0, %v1178_v18 }
 0x1bd   :  { %1041 = vmatmul.mubr.msk.f32.gmra.mrb[18].mxu1 %vm404_vm6, %v322_v10 }
 0x1be   :  { %1043 = vmatprep.mubr.msk.f32.mxu1 %vm1177_vm0, %v1178_v18 }
 0x1c1   :  { %1044 = vmatmul.mubr.msk.f32.gmra.mrb[20].mxu1 %vm404_vm6, %v323_v11  ;;  %v397_v11 = vpop.permute.xlu0 %396 }
 0x1c2   :  { %1046 = vmatprep.mubr.msk.f32.mxu1 %vm1177_vm0, %v1178_v18 }
 0x1c5   :  { %1047 = vmatmul.mubr.msk.f32.gmra.mrb[22].mxu1 %vm404_vm6, %v324_v13 }
 0x1c6   :  { %1049 = vmatprep.mubr.msk.f32.mxu1 %vm1177_vm0, %v1178_v18 }
 0x1c9   :  { %1050 = vmatmul.mubr.msk.f32.gmra.mrb[24].mxu1 %vm404_vm6, %v325_v14 }
 0x26c   :  { %v514_v15 = vpop.f32.mrb[0].mxu1 }
 0x26d   :  { %v1015_v16 = vpop.f32.mrb[1].mxu1  ;;  %v515_v19 = vadd.f32 %v514_v15, %v342_v17 }
 0x26f   :  { %v578_v24 = vmax.f32 %v515_v19, 0.0  ;;  %v402_v19 = vpop.permute.xlu1 %401 }
 0x270   :  { %v519_v21 = vpop.f32.mrb[2].mxu1 }
 0x271   :  { %v520_v22 = vadd.f32 %v519_v21, %v347_v20  ;;  %v1018_v23 = vpop.f32.mrb[3].mxu1 }
 0x273   :  { %v579_v25 = vmax.f32 %v520_v22, 0.0 }
 0x274   :  { %v524_v26 = vpop.f32.mrb[4].mxu1 }
 0x275   :  { %v1133_v27 = vpack.c.bf16 %v579_v25, %v578_v24  ;;  %v1021_v28 = vpop.f32.mrb[5].mxu1  ;;  %v525_v30 = vadd.f32 %v524_v26, %v352_v29  ;;  %v591_v25 = vld [vmem:[%s1555_s7] sm:$0xff]  ;;  %v593_v26 = vld [vmem:[%s1555_s7 + $0x10] sm:$0xff]  ;;  %v596_v29 = vld [vmem:[%s1555_s7 + $0x28] sm:$0xff] }
 0x276   :  { %v595_v28 = vld [vmem:[%s1555_s7 + $0x20] sm:$0xff] }
 0x277   :  { %1134 = vmatpush3.bf16.msra.mxu0 %v1133_v27  ;;  %v580_v35 = vmax.f32 %v525_v30, 0.0  ;;  %v594_v27 = vld [vmem:[%s1555_s7 + $0x18] sm:$0xff]  ;;  %v597_v30 = vld [vmem:[%s1555_s7 + $0x30] sm:$0x3] }
 0x278   :  { %v529_v32 = vpop.f32.mrb[6].mxu1  ;;  %1135 = vmatprep.subr.bf16.mxu0 %v1176_v12 }
 0x279   :  { %v530_v33 = vadd.f32 %v529_v32, %v357_v31  ;;  %v1024_v34 = vpop.f32.mrb[7].mxu1  ;;  %v773_v31 = vld [vmem:[%s1556_s9] sm:$0xff] }
 0x27a   :  { %v608_v34 = vpop.permute.xlu0 %607 }
 0x27b   :  { %v581_v36 = vmax.f32 %v530_v33, 0.0 }
 0x27c   :  { %v534_v37 = vpop.f32.mrb[8].mxu1 }
 0x27d   :  { %v1136_v38 = vpack.c.bf16 %v581_v36, %v580_v35  ;;  %v1027_v39 = vpop.f32.mrb[9].mxu1  ;;  %v535_v41 = vadd.f32 %v534_v37, %v362_v40  ;;  %v613_v36 = vpop.permute.xlu1 %612 }
 0x27f   :  { %1137 = vmatpush3.bf16.msra.mxu0 %v1136_v38  ;;  %v582_v46 = vmax.f32 %v535_v41, 0.0 }
 0x280   :  { %v539_v43 = vpop.f32.mrb[10].mxu1  ;;  %1138 = vmatprep.subr.bf16.mxu0 %v1176_v12 }
 0x281   :  { %v540_v44 = vadd.f32 %v539_v43, %v367_v42  ;;  %v1030_v45 = vpop.f32.mrb[11].mxu1 }
 0x283   :  { %v583_v47 = vmax.f32 %v540_v44, 0.0  ;;  %v618_v44 = vpop.permute.xlu0 %617 }
 0x284   :  { %v544_v48 = vpop.f32.mrb[12].mxu1 }
 0x285   :  { %v1139_v49 = vpack.c.bf16 %v583_v47, %v582_v46  ;;  %v1033_v50 = vpop.f32.mrb[13].mxu1  ;;  %v545_v52 = vadd.f32 %v544_v48, %v372_v51  ;;  %v623_v46 = vpop.permute.xlu1 %622 }
 0x287   :  { %1140 = vmatpush3.bf16.msra.mxu0 %v1139_v49  ;;  %v584_v57 = vmax.f32 %v545_v52, 0.0 }
 0x288   :  { %v549_v54 = vpop.f32.mrb[14].mxu1  ;;  %1141 = vmatprep.subr.bf16.mxu0 %v1176_v12 }
 0x289   :  { %v550_v55 = vadd.f32 %v549_v54, %v377_v53  ;;  %v1036_v56 = vpop.f32.mrb[15].mxu1 }
 0x28b   :  { %v585_v58 = vmax.f32 %v550_v55, 0.0  ;;  %v628_v55 = vpop.permute.xlu0 %627 }
 0x28c   :  { %v554_v59 = vpop.f32.mrb[16].mxu1 }
 0x28d   :  { %v1142_v60 = vpack.c.bf16 %v585_v58, %v584_v57  ;;  %v1039_v61 = vpop.f32.mrb[17].mxu1  ;;  %v555_v63 = vadd.f32 %v554_v59, %v382_v62  ;;  %v633_v57 = vpop.permute.xlu1 %632 }
 0x28f   :  { %1143 = vmatpush3.bf16.msra.mxu0 %v1142_v60  ;;  %v586_v4 = vmax.f32 %v555_v63, 0.0  ;;  %v638_v63 = vpop.permute.xlu0 %637 }
 0x290   :  { %v559_v1 = vpop.f32.mrb[18].mxu1  ;;  %1144 = vmatprep.subr.bf16.mxu0 %v1176_v12 }
 0x291   :  { %v560_v2 = vadd.f32 %v559_v1, %v387_v0  ;;  %v1042_v3 = vpop.f32.mrb[19].mxu1 }
 0x293   :  { %v587_v5 = vmax.f32 %v560_v2, 0.0 }
 0x294   :  { %v564_v6 = vpop.f32.mrb[20].mxu1 }
 0x295   :  { %v1145_v7 = vpack.c.bf16 %v587_v5, %v586_v4  ;;  %v1045_v8 = vpop.f32.mrb[21].mxu1  ;;  %v565_v10 = vadd.f32 %v564_v6, %v392_v9  ;;  %v774_v5 = vld [vmem:[%s1556_s9 + $0x8] sm:$0xff]  ;;  %v785_v6 = vpop.permute.xlu0 %784 }
 0x296   :  { %v780_v8 = vpop.permute.xlu1 %779 }
 0x297   :  { %1146 = vmatpush3.bf16.msra.mxu0 %v1145_v7  ;;  %v588_v16 = vmax.f32 %v565_v10, 0.0 }
 0x298   :  { %v569_v13 = vpop.f32.mrb[22].mxu1  ;;  %1147 = vmatprep.subr.bf16.mxu0 %v1176_v12  ;;  %v592_v12 = vld [vmem:[%s1555_s7 + $0x8] sm:$0xff] }
 0x299   :  { %v570_v14 = vadd.f32 %v569_v13, %v397_v11  ;;  %v1048_v15 = vpop.f32.mrb[23].mxu1 }
 0x29b   :  { %v589_v17 = vmax.f32 %v570_v14, 0.0 }
 0x29c   :  { %v574_v20 = vpop.f32.mrb[24].mxu1 }
 0x29d   :  { %v1148_v21 = vpack.c.bf16 %v589_v17, %v588_v16  ;;  %v575_v22 = vadd.f32 %v574_v20, %v402_v19  ;;  %v1051_v23 = vpop.f32.mrb[25].mxu1 }
 0x29f   :  { %1149 = vmatpush3.bf16.msra.mxu0 %v1148_v21  ;;  %v590_v24 = vmax.f32 %v575_v22, 0.0 }
 0x2a0   :  { %1076 = vmatprep.subr.mxu0 %v1178_v18 }
 0x2a3   :  { %1077 = vmatpush3.msk.msra.mxu0 %vm662_vm7, %v590_v24 }
 0x2a4   :  { %1079 = vmatmul.mubr.msk.f32.vlgmr.msra.gmra.mrb[14].mxu0 %vm640_vm8, %v591_v25 }
 0x2a5   :  { %1081 = vmatprep.mubr.msk.f32.mxu0 %vm1177_vm0, %v1178_v18 }
 0x2a8   :  { %1082 = vmatmul.mubr.msk.f32.gmra.mrb[16].mxu0 %vm640_vm8, %v592_v12 }
 0x2a9   :  { %1084 = vmatprep.mubr.msk.f32.mxu0 %vm1177_vm0, %v1178_v18 }
 0x2ac   :  { %1085 = vmatmul.mubr.msk.f32.gmra.mrb[18].mxu0 %vm640_vm8, %v593_v26 }
 0x2ad   :  { %1087 = vmatprep.mubr.msk.f32.mxu0 %vm1177_vm0, %v1178_v18 }
 0x2b0   :  { %1088 = vmatmul.mubr.msk.f32.gmra.mrb[20].mxu0 %vm640_vm8, %v594_v27 }
 0x2b1   :  { %1090 = vmatprep.mubr.msk.f32.mxu0 %vm1177_vm0, %v1178_v18 }
 0x2b4   :  { %1091 = vmatmul.mubr.msk.f32.gmra.mrb[22].mxu0 %vm640_vm8, %v595_v28 }
 0x2b5   :  { %1093 = vmatprep.mubr.msk.f32.mxu0 %vm1177_vm0, %v1178_v18 }
 0x2b8   :  { %1094 = vmatmul.mubr.msk.f32.gmra.mrb[24].mxu0 %vm640_vm8, %v596_v29 }
 0x2b9   :  { %1096 = vmatprep.mubr.msk.f32.mxu0 %vm1177_vm0, %v1178_v18 }
 0x2bc   :  { %1097 = vmatmul.mubr.msk.f32.gmra.mrb[26].mxu0 %vm640_vm8, %v597_v30 }
 0x2bd   :  { %1113 = vmatprep.mubr.msk.f32.mxu0 %vm404_vm6, %v773_v31 }
 0x377   :  { %v732_v32 = vpop.f32.mrb[14].mxu0 }
 0x378   :  { %v1080_v33 = vpop.f32.mrb[15].mxu0  ;;  %v733_v35 = vadd.f32 %v732_v32, %v608_v34 }
 0x37a   :  { %v766_v39 = vmax.f32 %v733_v35, 0.0 }
 0x37b   :  { %v737_v37 = vpop.f32.mrb[16].mxu0 }
 0x37c   :  { %v738_v38 = vadd.f32 %v737_v37, %v613_v36  ;;  %v1083_v18 = vpop.f32.mrb[17].mxu0 }
 0x37e   :  { %v767_v40 = vmax.f32 %v738_v38, 0.0 }
 0x37f   :  { %v742_v41 = vpop.f32.mrb[18].mxu0 }
 0x380   :  { %v1150_v42 = vpack.c.bf16 %v767_v40, %v766_v39  ;;  %v1086_v43 = vpop.f32.mrb[19].mxu0  ;;  %v743_v45 = vadd.f32 %v742_v41, %v618_v44 }
 0x382   :  { %1151 = vmatprep.subr.bf16.mxu0 %v1150_v42  ;;  %v768_v50 = vmax.f32 %v743_v45, 0.0 }
 0x383   :  { %v747_v47 = vpop.f32.mrb[20].mxu0  ;;  %1153 = vmatpush3.bf16.msra.mxu0 %v1150_v42 }
 0x384   :  { %v748_v48 = vadd.f32 %v747_v47, %v623_v46  ;;  %v1089_v49 = vpop.f32.mrb[21].mxu0 }
 0x386   :  { %v769_v51 = vmax.f32 %v748_v48, 0.0 }
 0x387   :  { %v752_v52 = vpop.f32.mrb[22].mxu0 }
 0x388   :  { %v1154_v53 = vpack.c.bf16 %v769_v51, %v768_v50  ;;  %v1092_v54 = vpop.f32.mrb[23].mxu0  ;;  %v753_v56 = vadd.f32 %v752_v52, %v628_v55 }
 0x38a   :  { %1155 = vmatprep.subr.bf16.mxu0 %v1154_v53  ;;  %v770_v61 = vmax.f32 %v753_v56, 0.0 }
 0x38b   :  { %v757_v58 = vpop.f32.mrb[24].mxu0  ;;  %1157 = vmatpush3.bf16.msra.mxu0 %v1154_v53 }
 0x38c   :  { %v758_v59 = vadd.f32 %v757_v58, %v633_v57  ;;  %v1095_v60 = vpop.f32.mrb[25].mxu0 }
 0x38e   :  { %v771_v62 = vmax.f32 %v758_v59, 0.0 }
 0x38f   :  { %v762_v0 = vpop.f32.mrb[26].mxu0 }
 0x390   :  { %v1158_v1 = vpack.c.bf16 %v771_v62, %v770_v61  ;;  %v763_v2 = vadd.f32 %v762_v0, %v638_v63  ;;  %v1098_v3 = vpop.f32.mrb[27].mxu0 }
 0x392   :  { %v772_v4 = vmax.f32 %v763_v2, 0.0  ;;  %1159 = vmatprep.subr.bf16.mxu0 %v1158_v1 }
 0x393   :  { %1161 = vmatpush3.bf16.msra.mxu0 %v1158_v1 }
 0x394   :  { %1111 = vmatprep.subr.msk.mxu0 %vm444_vm5, %v772_v4 }
 0x397   :  { %1112 = vmatpush3.msk.msra.mxu0 %vm444_vm5, %v772_v4 }
 0x398   :  { %1114 = vmatmul.mubr.msk.f32.vlgmr.msra.gmra.mrb[28].mxu0 %vm404_vm6, %v774_v5 }
 0x46b   :  { %v1115_v7 = vpop.f32.mrb[28].mxu0 }
 0x46c   :  { %v868_v9 = vadd.f32 %v1115_v7, %v785_v6  ;;  %v862_v10 = vpop.f32.mrb[29].mxu0 }
 0x46d   :  { %v863_v11 = vadd.f32 %v862_v10, %v780_v8 }
 0x46e   :  { %872 = vst [vmem:[%s1557_s11 + $0x8] sm:$0xff] %v868_v9 }
 0x46f   :  { %871 = vst [vmem:[%s1557_s11] sm:$0xff] %v863_v11 }

</bundles_post_ra>
